<compile_context>
chip_gen: v7x
topology: tpu7x:2x2x1
jax: 0.10.0
libtpu: 0.0.40
codegen_flags: <defaults>
</compile_context>

<pallas_src>
import jax
import jax.numpy as jnp
from jax.experimental import pallas as pl
from jax.experimental.pallas import tpu as pltpu


def _sqex_kernel(x_ref, w1_ref, b1_ref, w2t_ref, b2_ref, o_ref):
    # x_ref:   (tm, F)   input rows
    # w1_ref:  (H, F)    linear1.weight (PyTorch layout)
    # b1_ref:  (1, H)    linear1.bias
    # w2t_ref: (H, F)    linear2.weight.T
    # b2_ref:  (1, F)    linear2.bias
    x = x_ref[...]
    xf = x.astype(jnp.float32)
    H = w1_ref.shape[0]
    b2 = b2_ref[...].astype(jnp.float32)

    if H <= 8:
        # VPU/XLU path: an MXU dot here would be filled only H/256; do H
        # lane-reductions + broadcast FMAs instead (VPU has plenty of slack in a
        # mem-bound kernel, and the MXU dependency chain disappears entirely).
        w1 = w1_ref[...].astype(jnp.float32)     # (H, F)
        w2t = w2t_ref[...].astype(jnp.float32)   # (H, F)
        b1 = b1_ref[...].astype(jnp.float32)     # (1, H)
        y = jnp.broadcast_to(b2, xf.shape)       # hoisted once (not per-j)
        for j in range(H):                       # unrolled at trace time
            hj = jnp.sum(xf * w1[j:j + 1, :], axis=-1, keepdims=True)   # (tm, 1)
            hj = jnp.maximum(hj + b1[:, j:j + 1], 0.0)                  # ReLU
            y = y + hj * w2t[j:j + 1, :]                                # FMA
    else:
        # MXU path for non-tiny hidden dims.
        h = jax.lax.dot_general(
            x, w1_ref[...],
            dimension_numbers=(((1,), (1,)), ((), ())),   # contract over F
            preferred_element_type=jnp.float32)
        h = jnp.maximum(h + b1_ref[...].astype(jnp.float32), 0.0)
        y = jnp.dot(h.astype(w2t_ref.dtype), w2t_ref[...],
                    preferred_element_type=jnp.float32) + b2

    y = jax.nn.sigmoid(y)
    o_ref[...] = (xf * y).astype(o_ref.dtype)


def _round_up(a, b):
    return ((a + b - 1) // b) * b


def sqex_pallas(x, w1, b1, w2, b2, *, row_tile=None,
                vmem_limit_bytes=32 * 1024 * 1024):
    """x: (..., F). w1: (H, F), b1: (H,), w2: (F, H), b2: (F,)."""
    orig_shape = x.shape
    F = orig_shape[-1]
    H = w1.shape[0]
    x2d = x.reshape(-1, F)
    M = x2d.shape[0]

    itemsize = jnp.dtype(x.dtype).itemsize
    sub = max(8, 32 // itemsize)        # sublane packing: 8 (f32), 16 (bf16), 32 (int8)

    if row_tile is None:
        # Size tm so double-buffered x + out tiles (4 * tm * F * itemsize) stay
        # within ~12 MiB, leaving scoped-VMEM headroom for weights on all gens.
        budget = 12 * 1024 * 1024
        tm = budget // (4 * F * itemsize)
        tm = min(tm, 4096)
    else:
        tm = row_tile
    tm = min(tm, _round_up(M, sub))     # don't over-pad small inputs
    tm = max(sub, (tm // sub) * sub)

    # Uniform grid via cdiv + pad (no whole-array fallback).
    M_pad = _round_up(M, tm)
    if M_pad != M:
        x2d = jnp.pad(x2d, ((0, M_pad - M), (0, 0)))

    w2t = w2.T                           # (H, F)
    b1r = b1.reshape(1, H)
    b2r = b2.reshape(1, F)

    out2d = pl.pallas_call(
        _sqex_kernel,
        out_shape=jax.ShapeDtypeStruct((M_pad, F), x.dtype),
        grid_spec=pltpu.PrefetchScalarGridSpec(
            num_scalar_prefetch=0,
            grid=(M_pad // tm,),
            in_specs=[
                pl.BlockSpec((tm, F), lambda i: (i, 0)),   # x rows tile
                pl.BlockSpec((H, F), lambda i: (0, 0)),    # W1 (VMEM-resident)
                pl.BlockSpec((1, H), lambda i: (0, 0)),    # b1
                pl.BlockSpec((H, F), lambda i: (0, 0)),    # W2^T (VMEM-resident)
                pl.BlockSpec((1, F), lambda i: (0, 0)),    # b2
            ],
            out_specs=pl.BlockSpec((tm, F), lambda i: (i, 0)),
        ),
        compiler_params=pltpu.CompilerParams(
            dimension_semantics=("parallel",),
            vmem_limit_bytes=vmem_limit_bytes),
    )(x2d, w1, b1r, w2t, b2r)

    if M_pad != M:
        out2d = out2d[:M]
    return out2d.reshape(orig_shape)


def sqex_reference(x, w1, b1, w2, b2):
    h = jnp.maximum(x @ w1.T + b1, 0.0)
    y = jax.nn.sigmoid(h @ w2.T + b2)
    return x * y


if __name__ == "__main__":
    key = jax.random.PRNGKey(0)
    (kx, kw1, kb1, kw2, kb2,
     kx2, kw3, kb3, kw4, kb4) = jax.random.split(key, 10)

    # --- Demo shape matching the PyTorch module: n_features=32, reduction=16 ---
    n_features = 32
    reduction = 16
    hidden = n_features // reduction          # 2 -> VPU/XLU path

    x = jax.random.normal(kx, (2, 8, n_features), dtype=jnp.float32)
    w1 = jax.random.normal(kw1, (hidden, n_features), dtype=jnp.float32) * 0.1
    b1 = jax.random.normal(kb1, (hidden,), dtype=jnp.float32) * 0.1
    w2 = jax.random.normal(kw2, (n_features, hidden), dtype=jnp.float32) * 0.1
    b2 = jax.random.normal(kb2, (n_features,), dtype=jnp.float32) * 0.1

    out = jax.block_until_ready(sqex_pallas(x, w1, b1, w2, b2))
    ref = sqex_reference(x, w1, b1, w2, b2)
    assert out.shape == x.shape
    assert jnp.allclose(out, ref, atol=1e-5, rtol=1e-5), "mismatch (VPU path)"

    # --- Second check: larger hidden dim (MXU path), row count that needs
    #     padding, and a multi-step grid (exercises cdiv+pad tiling) ---
    F2, H2 = 256, 16
    x_b = jax.random.normal(kx2, (5, 9, F2), dtype=jnp.float32)   # M = 45
    w1_b = jax.random.normal(kw3, (H2, F2), dtype=jnp.float32) * 0.05
    b1_b = jax.random.normal(kb3, (H2,), dtype=jnp.float32) * 0.05
    w2_b = jax.random.normal(kw4, (F2, H2), dtype=jnp.float32) * 0.05
    b2_b = jax.random.normal(kb4, (F2,), dtype=jnp.float32) * 0.05

    out_b = jax.block_until_ready(
        sqex_pallas(x_b, w1_b, b1_b, w2_b, b2_b, row_tile=16))    # 3 grid steps
    ref_b = sqex_reference(x_b, w1_b, b1_b, w2_b, b2_b)
    assert out_b.shape == x_b.shape
    assert jnp.allclose(out_b, ref_b, atol=1e-4, rtol=1e-4), "mismatch (MXU path)"

    print("KERNEL_OK")
</pallas_src>

<mosaic_0001>
module attributes {stable_mosaic.version = 11 : i64} {
  func.func @_sqex_kernel(%arg0: i32, %arg1: memref<16x32xf32, #tpu.memory_space<vmem>>, %arg2: memref<2x32xf32, #tpu.memory_space<vmem>>, %arg3: memref<1x2xf32, #tpu.memory_space<vmem>>, %arg4: memref<2x32xf32, #tpu.memory_space<vmem>>, %arg5: memref<1x32xf32, #tpu.memory_space<vmem>>, %arg6: memref<16x32xf32, #tpu.memory_space<vmem>>) attributes {dimension_semantics = [#tpu.dimension_semantics<parallel>], iteration_bounds = array<i64: 1>, scalar_prefetch = 0 : i64, scratch_operands = 0 : i64, tpu.core_type = #tpu.core_type<tc>, window_params = [{transform_indices = @transform_0, window_bounds = array<i64: 16, 32>}, {pipeline_mode = #tpu.pipeline_mode<synchronous>, transform_indices = @transform_1, window_bounds = array<i64: 2, 32>}, {pipeline_mode = #tpu.pipeline_mode<synchronous>, transform_indices = @transform_2, window_bounds = array<i64: 1, 2>}, {pipeline_mode = #tpu.pipeline_mode<synchronous>, transform_indices = @transform_3, window_bounds = array<i64: 2, 32>}, {pipeline_mode = #tpu.pipeline_mode<synchronous>, transform_indices = @transform_4, window_bounds = array<i64: 1, 32>}, {transform_indices = @transform_5, window_bounds = array<i64: 16, 32>}]} {
    %c0 = arith.constant 0 : index
    %c0_0 = arith.constant 0 : index
    %0 = vector.load %arg1[%c0, %c0_0] : memref<16x32xf32, #tpu.memory_space<vmem>>, vector<16x32xf32>
    %c0_1 = arith.constant 0 : index
    %c0_2 = arith.constant 0 : index
    %1 = vector.load %arg5[%c0_1, %c0_2] : memref<1x32xf32, #tpu.memory_space<vmem>>, vector<1x32xf32>
    %c0_3 = arith.constant 0 : index
    %c0_4 = arith.constant 0 : index
    %2 = vector.load %arg2[%c0_3, %c0_4] : memref<2x32xf32, #tpu.memory_space<vmem>>, vector<2x32xf32>
    %c0_5 = arith.constant 0 : index
    %c0_6 = arith.constant 0 : index
    %3 = vector.load %arg4[%c0_5, %c0_6] : memref<2x32xf32, #tpu.memory_space<vmem>>, vector<2x32xf32>
    %c0_7 = arith.constant 0 : index
    %c0_8 = arith.constant 0 : index
    %4 = vector.load %arg3[%c0_7, %c0_8] : memref<1x2xf32, #tpu.memory_space<vmem>>, vector<1x2xf32>
    %5 = vector.shape_cast %1 : vector<1x32xf32> to vector<1x32xf32>
    %6 = vector.broadcast %5 : vector<1x32xf32> to vector<16x32xf32>
    %7 = vector.extract_strided_slice %2 {offsets = [0, 0], sizes = [1, 32], strides = [1, 1]} : vector<2x32xf32> to vector<1x32xf32>
    %8 = vector.broadcast %7 : vector<1x32xf32> to vector<16x32xf32>
    %9 = arith.mulf %0, %8 : vector<16x32xf32>
    %cst = arith.constant dense<0.000000e+00> : vector<16xf32>
    %10 = vector.multi_reduction <add>, %9, %cst [1] : vector<16x32xf32> to vector<16xf32>
    %11 = vector.shape_cast %10 : vector<16xf32> to vector<16x1xf32>
    %12 = vector.extract_strided_slice %4 {offsets = [0, 0], sizes = [1, 1], strides = [1, 1]} : vector<1x2xf32> to vector<1x1xf32>
    %13 = vector.broadcast %12 : vector<1x1xf32> to vector<16x1xf32>
    %14 = arith.addf %11, %13 : vector<16x1xf32>
    %cst_9 = arith.constant 0.000000e+00 : f32
    %15 = vector.broadcast %cst_9 : f32 to vector<16x1xf32>
    %16 = arith.maximumf %14, %15 : vector<16x1xf32>
    %17 = vector.extract_strided_slice %3 {offsets = [0, 0], sizes = [1, 32], strides = [1, 1]} : vector<2x32xf32> to vector<1x32xf32>
    %18 = vector.broadcast %16 : vector<16x1xf32> to vector<16x32xf32>
    %19 = vector.broadcast %17 : vector<1x32xf32> to vector<16x32xf32>
    %20 = arith.mulf %18, %19 : vector<16x32xf32>
    %21 = arith.addf %6, %20 : vector<16x32xf32>
    %22 = vector.extract_strided_slice %2 {offsets = [1, 0], sizes = [1, 32], strides = [1, 1]} : vector<2x32xf32> to vector<1x32xf32>
    %23 = vector.broadcast %22 : vector<1x32xf32> to vector<16x32xf32>
    %24 = arith.mulf %0, %23 : vector<16x32xf32>
    %cst_10 = arith.constant dense<0.000000e+00> : vector<16xf32>
    %25 = vector.multi_reduction <add>, %24, %cst_10 [1] : vector<16x32xf32> to vector<16xf32>
    %26 = vector.shape_cast %25 : vector<16xf32> to vector<16x1xf32>
    %27 = vector.extract_strided_slice %4 {offsets = [0, 1], sizes = [1, 1], strides = [1, 1]} : vector<1x2xf32> to vector<1x1xf32>
    %28 = vector.broadcast %27 : vector<1x1xf32> to vector<16x1xf32>
    %29 = arith.addf %26, %28 : vector<16x1xf32>
    %cst_11 = arith.constant 0.000000e+00 : f32
    %30 = vector.broadcast %cst_11 : f32 to vector<16x1xf32>
    %31 = arith.maximumf %29, %30 : vector<16x1xf32>
    %32 = vector.extract_strided_slice %3 {offsets = [1, 0], sizes = [1, 32], strides = [1, 1]} : vector<2x32xf32> to vector<1x32xf32>
    %33 = vector.broadcast %31 : vector<16x1xf32> to vector<16x32xf32>
    %34 = vector.broadcast %32 : vector<1x32xf32> to vector<16x32xf32>
    %35 = arith.mulf %33, %34 : vector<16x32xf32>
    %36 = arith.addf %21, %35 : vector<16x32xf32>
    %37 = arith.negf %36 : vector<16x32xf32>
    %38 = math.exp %37 : vector<16x32xf32>
    %cst_12 = arith.constant 1.000000e+00 : f32
    %39 = vector.broadcast %cst_12 : f32 to vector<16x32xf32>
    %40 = arith.addf %39, %38 : vector<16x32xf32>
    %41 = arith.divf %39, %40 : vector<16x32xf32>
    %42 = arith.mulf %0, %41 : vector<16x32xf32>
    %c0_13 = arith.constant 0 : index
    %c0_14 = arith.constant 0 : index
    %43 = vector.load %arg6[%c0_13, %c0_14] : memref<16x32xf32, #tpu.memory_space<vmem>>, vector<16x32xf32>
    tpu.vector_store %arg6[%c0_13, %c0_14], %42 {strides = array<i32>} : memref<16x32xf32, #tpu.memory_space<vmem>>, vector<16x32xf32>,
    return
  }
  func.func @transform_0(%arg0: i32) -> (i32, i32) {
    %c0_i32 = arith.constant 0 : i32
    %c0_i32_0 = arith.constant 0 : i32
    return %arg0, %c0_i32 : i32, i32
  }
  func.func @transform_1(%arg0: i32) -> (i32, i32) {
    %c0_i32 = arith.constant 0 : i32
    %c0_i32_0 = arith.constant 0 : i32
    %c0_i32_1 = arith.constant 0 : i32
    return %c0_i32, %c0_i32_0 : i32, i32
  }
  func.func @transform_2(%arg0: i32) -> (i32, i32) {
    %c0_i32 = arith.constant 0 : i32
    %c0_i32_0 = arith.constant 0 : i32
    %c0_i32_1 = arith.constant 0 : i32
    return %c0_i32, %c0_i32_0 : i32, i32
  }
  func.func @transform_3(%arg0: i32) -> (i32, i32) {
    %c0_i32 = arith.constant 0 : i32
    %c0_i32_0 = arith.constant 0 : i32
    %c0_i32_1 = arith.constant 0 : i32
    return %c0_i32, %c0_i32_0 : i32, i32
  }
  func.func @transform_4(%arg0: i32) -> (i32, i32) {
    %c0_i32 = arith.constant 0 : i32
    %c0_i32_0 = arith.constant 0 : i32
    %c0_i32_1 = arith.constant 0 : i32
    return %c0_i32, %c0_i32_0 : i32, i32
  }
  func.func @transform_5(%arg0: i32) -> (i32, i32) {
    %c0_i32 = arith.constant 0 : i32
    %c0_i32_0 = arith.constant 0 : i32
    return %arg0, %c0_i32 : i32, i32
  }
}

</mosaic_0001>

<bundles_post_ra>
// kernel: tpu_custom_call.1
= control target key start
LH: loop header
LB: loop body
LE: loop exit
PB: predicated region body
PF: predicated region fallthrough
CT: control target
= control target key end

     0   :  { %10 = vsyncpa [#allocation3], 0  ;;  %s319_s0 = inlined_call_operand.hbm [shape: f32[16,32], index: 0, kind: input, shape index: {}]   ;;  %s320_s1 = inlined_call_operand.vmem [shape: f32[2,32], index: 1, kind: input, shape index: {}]   ;;  %s321_s2 = inlined_call_operand.vmem [shape: f32[1,2], index: 2, kind: input, shape index: {}]   ;;  %s322_s3 = inlined_call_operand.vmem [shape: f32[2,32], index: 3, kind: input, shape index: {}]   ;;  %s323_s4 = inlined_call_operand.vmem [shape: f32[1,32], index: 4, kind: input, shape index: {}]   ;;  %s324_s5 = inlined_call_operand.hbm [shape: f32[16,32], index: 5, kind: output, shape index: {}]  }
   0x1   :  { %11 = vsyncpa [#allocation4], 0  ;;  %s225_s18 = smov [#allocation2]   ;;  %s177_s22 = scalar_lea.hbm %s319_s0, 256 }
   0x2   :  { %s17_s19 = sshll.u32 %s225_s18, 4  ;;  %p178_p0 = scmp.ne.s32.totalorder %s319_s0, %s177_s22  ;;  %s18_s19 = int_to_ptr.vmem [resolvable:$true] %s17_s19 }
   0x3   :  { %p181_p1 = scmp.lt.u32.totalorder %s177_s22, %s319_s0 }
   0x5   :  { %p183_p2 = pnand %p181_p1, %p178_p0 }
   0x7   :  { %186 = shalt.err (!%p183_p2)
}
   0x8   :  { %s187_s27 = scalar_lea.vmem %s18_s19, 256  ;;  %p192_p4 = scmp.lt.s32.totalorder %s18_s19, %s18_s19 }
   0x9   :  { %p188_p3 = scmp.ne.s32.totalorder %s18_s19, %s187_s27  ;;  %p193_p5 = scmp.lt.s32.totalorder %s187_s27, %s187_s27 }
   0xb   :  { %p194_p6 = por %p193_p5, %p192_p4 }
   0xd   :  { %p195_p7 = pnand %p194_p6, %p188_p3 }
   0xf   :  { %198 = shalt.err (!%p195_p7)
}
  0x10   :  { %s226_s28 = smov 128   ;;  %s227_s29 = smov 8  }
  0x11   :  { %23 = dma.hbm_to_vmem [thread:$0]  %s319_s0, 256, %s18_s19, [#allocation3], %s226_s28, %s226_s28, %s227_s29  }
  0x12   :  { %221 = dma.done.wait [#allocation3], 256  }
  0x13   :  { %222 = vsyncadd [#allocation3], 4294967040  ;;  %v47_v0 = vlaneseq  ;;  %v276_v4 = vld [vmem:[#allocation2] sm:$0xff]  ;;  %v281_v6 = vld [vmem:[#allocation2 + $0x8] sm:$0xff]  ;;  %vm53_vm0 = vcmask 261120   ;;  %v228_v17 = vmov 0  }
  0x14   :  { %v38_v5 = vld [vmem:[%s320_s1] sm:$0x3]  ;;  %165 = vset.pattern.permute.xlu0 %v228_v17  ;;  %166 = vset.pattern.permute.xlu1 %v228_v17  ;;  %v229_v28 = vmov 1  }
  0x15   :  { %v48_v1 = vshrl.u32 %v47_v0, 7  ;;  %v156_v18 = vld [vmem:[%s321_s2] ss:$0 sm:$0xff] }
  0x16   :  { %v39_v32 = vld [vmem:[%s322_s3] sm:$0x3]  ;;  %s230_s3 = smov [#allocation5]  }
  0x17   :  { %v49_v2 = vsub.s32 0, %v48_v1  ;;  %v90_v3 = vsub.s32 1, %v48_v1  ;;  %v155_v38 = vld [vmem:[%s323_s4] ss:$0 sm:$0xff]  ;;  %s143_s4 = sshll.u32 %s230_s3, 4  ;;  %s144_s4 = int_to_ptr.vmem [resolvable:$true] %s143_s4 }
  0x18   :  { %s199_s12 = scalar_lea.vmem %s144_s4, 256  ;;  %p204_p9 = scmp.lt.s32.totalorder %s144_s4, %s144_s4 }
  0x19   :  { %v50_v7 = vrot.slane %v38_v5, %v49_v2  ;;  %v91_v8 = vrot.slane %v38_v5, %v90_v3  ;;  %v83_v33 = vrot.slane %v39_v32, %v49_v2  ;;  %v117_v37 = vrot.slane %v39_v32, %v90_v3  ;;  %p200_p8 = scmp.ne.s32.totalorder %s144_s4, %s199_s12  ;;  %p205_p10 = scmp.lt.s32.totalorder %s199_s12, %s199_s12 }
  0x1b   :  { %v51_v9 = vmul.f32 %v50_v7, %v276_v4  ;;  %v52_v10 = vmul.f32 %v50_v7, %v281_v6  ;;  %v92_v11 = vmul.f32 %v91_v8, %v276_v4  ;;  %v93_v12 = vmul.f32 %v91_v8, %v281_v6  ;;  %p206_p11 = por %p205_p10, %p204_p9 }
  0x1d   :  { %v54_v13 = vsel %vm53_vm0, %v51_v9, 0.0  ;;  %v94_v14 = vsel %vm53_vm0, %v92_v11, 0.0  ;;  %v57_v15 = vsel %vm53_vm0, %v52_v10, 0.0  ;;  %v97_v16 = vsel %vm53_vm0, %v93_v12, 0.0  ;;  %p207_p12 = pnand %p206_p11, %p200_p8 }
  0x1e   :  { %55 = vadd.xlane.f32.xlu0 %v54_v13  ;;  %95 = vadd.xlane.f32.xlu1 %v94_v14 }
  0x22   :  { %58 = vadd.xlane.f32.xlu0 %v57_v15  ;;  %98 = vadd.xlane.f32.xlu1 %v97_v16 }
  0xab   :  { %v56_v19 = vpop.xlane.xlu0 %55  ;;  %v96_v21 = vpop.xlane.xlu1 %95 }
  0xac   :  { %v66_v20 = vadd.f32 %v156_v18, %v56_v19  ;;  %v100_v25 = vadd.f32 %v156_v18, %v96_v21 }
  0xae   :  { %v68_v22 = vmax.f32 %v66_v20, 0.0  ;;  %v102_v29 = vmax.f32 %v100_v25, 0.0 }
  0xaf   :  { %v59_v23 = vpop.xlane.xlu0 %58  ;;  %v99_v27 = vpop.xlane.xlu1 %98 }
  0xb0   :  { %v67_v24 = vadd.f32 %v156_v18, %v59_v23  ;;  %72 = vperm.xlu0 %165, %v68_v22   ;;  %v101_v30 = vadd.f32 %v156_v18, %v99_v27 }
  0xb2   :  { %v69_v26 = vmax.f32 %v67_v24, 0.0  ;;  %v103_v31 = vmax.f32 %v101_v30, 0.0 }
  0xb4   :  { %77 = vperm.xlu1 %166, %v69_v26   ;;  %168 = vset.pattern.permute.xlu0 %v229_v28 }
  0xb8   :  { %167 = vset.pattern.permute.xlu1 %v229_v28 }
  0xb9   :  { %106 = vperm.xlu1 %167, %v102_v29  }
  0xbd   :  { %111 = vperm.xlu1 %167, %v103_v31  }
 0x12f   :  { %v73_v34 = vpop.permute.xlu0 %72 }
 0x130   :  { %v84_v36 = vmul.f32 %v83_v33, %v73_v34 }
 0x132   :  { %v86_v40 = vadd.f32 %v155_v38, %v84_v36 }
 0x133   :  { %v78_v35 = vpop.permute.xlu1 %77 }
 0x134   :  { %v85_v41 = vmul.f32 %v83_v33, %v78_v35 }
 0x136   :  { %v87_v45 = vadd.f32 %v155_v38, %v85_v41 }
 0x138   :  { %v107_v39 = vpop.permute.xlu1 %106 }
 0x139   :  { %v118_v42 = vmul.f32 %v117_v37, %v107_v39 }
 0x13b   :  { %v120_v43 = vadd.f32 %v118_v42, %v86_v40 }
 0x13c   :  { %v112_v44 = vpop.permute.xlu1 %111 }
 0x13d   :  { %v157_v46 = vmul.f32 -1.442695, %v120_v43  ;;  %v119_v47 = vmul.f32 %v117_v37, %v112_v44 }
 0x13f   :  { %169 = vpow2.f32 %v157_v46  ;;  %v121_v48 = vadd.f32 %v119_v47, %v87_v45 }
 0x141   :  { %v158_v49 = vmul.f32 -1.442695, %v121_v48 }
 0x143   :  { %171 = vpow2.f32 %v158_v49 }
 0x149   :  { %v170_v50 = vpop.eup %169 }
 0x14a   :  { %v128_v51 = vadd.f32 1.0, %v170_v50 }
 0x14c   :  { %173 = vrcp.f32 %v128_v51 }
 0x14d   :  { %v172_v52 = vpop.eup %171 }
 0x14e   :  { %v129_v53 = vadd.f32 1.0, %v172_v52 }
 0x150   :  { %175 = vrcp.f32 %v129_v53 }
 0x156   :  { %v174_v54 = vpop.eup %173 }
 0x157   :  { %v134_v55 = vmul.f32 %v174_v54, %v276_v4 }
 0x159   :  { %136 = vst.msk [vmem:[#allocation5] sm:$0xff] %vm53_vm0, %v134_v55 }
 0x15a   :  { %v176_v56 = vpop.eup %175 }
 0x15b   :  { %v135_v57 = vmul.f32 %v176_v56, %v281_v6 }
 0x15d   :  { %137 = vst.msk [vmem:[#allocation5 + $0x8] sm:$0xff] %vm53_vm0, %v135_v57 }
 0x15e   :  { %210 = shalt.err (!%p207_p12)
}
 0x15f   :  { %s211_s15 = scalar_lea.hbm %s324_s5, 256 }
 0x160   :  { %p212_p13 = scmp.ne.s32.totalorder %s324_s5, %s211_s15  ;;  %p215_p0 = scmp.lt.u32.totalorder %s211_s15, %s324_s5 }
 0x162   :  { %p217_p1 = pnand %p215_p0, %p212_p13 }
 0x164   :  { %220 = shalt.err (!%p217_p1)
}
 0x165   :  { %149 = dma.vmem_to_hbm [thread:$0]  %s144_s4, 256, %s324_s5, [#allocation4], %s226_s28, %s226_s28, %s227_s29  }
 0x166   :  { %223 = dma.done.wait [#allocation4], 256  }
 0x167   :  { %224 = vsyncadd [#allocation4], 4294967040 }
 0x168   :  { %153 = vsyncpa [#allocation3], 1 }
 0x169   :  { %154 = vsyncpa [#allocation4], 1 }

</bundles_post_ra>
